<compile_context>
chip_gen: v6e
topology: v6e:2x2x1
jax: 0.10.0
libtpu: 0.0.40
codegen_flags: <defaults>
</compile_context>

<pallas_src>
import jax
import jax.numpy as jnp
from jax import lax
from jax.experimental import pallas as pl
from jax.experimental.pallas import tpu as pltpu


def _round_up(x, m):
    return (x + m - 1) // m * m


# ---------------------------------------------------------------------------
# Weight-resident path (common case: W^T fits VMEM).  Grid over M only.
# ---------------------------------------------------------------------------
def _make_wres_kernel(compute_dtype):
    def kernel(x_ref, w_ref, b_ref, o_ref):
        # x_ref: (tm, F), w_ref: (F, Cp) resident, b_ref: (1, Cp)
        xv = x_ref[...]
        if compute_dtype is not None:
            xv = xv.astype(compute_dtype)
        acc = jnp.dot(xv, w_ref[...], preferred_element_type=jnp.float32)
        o_ref[...] = (acc + b_ref[...]).astype(o_ref.dtype)
    return kernel


def _forward_weight_resident(x, weight, bias, *, tm, compute_dtype=None):
    B, F = x.shape
    C = weight.shape[0]
    Cp = _round_up(C, 128)            # lane-dense output (full-width stores)
    out_dtype = x.dtype

    w_dtype = compute_dtype if compute_dtype is not None else weight.dtype
    # Pre-transpose W once in the wrapper (tiny, amortized): kernel does a
    # plain NN matmul, no in-kernel transpose.  Zero-pad classes to Cp.
    w_t = jnp.zeros((F, Cp), w_dtype).at[:, :C].set(weight.T.astype(w_dtype))
    b_p = jnp.zeros((1, Cp), jnp.float32).at[0, :C].set(
        bias.astype(jnp.float32))

    grid_m = pl.cdiv(B, tm)
    x_bytes = jnp.dtype(x.dtype).itemsize
    w_bytes = jnp.dtype(w_dtype).itemsize

    out = pl.pallas_call(
        _make_wres_kernel(compute_dtype),
        out_shape=jax.ShapeDtypeStruct((B, Cp), out_dtype),
        grid=(grid_m,),
        in_specs=[
            pl.BlockSpec((tm, F), lambda i: (i, 0)),
            pl.BlockSpec((F, Cp), lambda i: (0, 0)),   # constant -> resident
            pl.BlockSpec((1, Cp), lambda i: (0, 0)),   # constant -> resident
        ],
        out_specs=pl.BlockSpec((tm, Cp), lambda i: (i, 0)),
        compiler_params=pltpu.CompilerParams(
            dimension_semantics=("parallel",),
            vmem_limit_bytes=48 * 1024 * 1024,
        ),
        cost_estimate=pl.CostEstimate(
            flops=2 * B * F * Cp,
            transcendentals=0,
            bytes_accessed=(B * F * x_bytes          # x read once
                            + F * Cp * w_bytes       # W^T read once
                            + Cp * 4                 # bias
                            + B * Cp * jnp.dtype(out_dtype).itemsize),
        ),
    )(x, w_t, b_p)
    return out[:, :C]


# ---------------------------------------------------------------------------
# Tiled (M, N, K) fallback for large F / C.  x is NOT padded in HBM.
# ---------------------------------------------------------------------------
def _make_tiled_kernel(F, tk, compute_dtype, accumulate_in_out):
    rem = F % tk  # static

    def _partial(x_ref, w_ref):
        xv = x_ref[...]
        if compute_dtype is not None:
            xv = xv.astype(compute_dtype)
        if rem:
            # x is unpadded in HBM: the OOB K columns of the tail tile are
            # garbage (possibly NaN/Inf), so zero them explicitly instead of
            # relying on padded-W zeros (NaN * 0 = NaN).
            k = pl.program_id(2)
            col = lax.broadcasted_iota(jnp.int32, xv.shape, 1) + k * tk
            xv = jnp.where(col < F, xv, jnp.zeros_like(xv))
        return jnp.dot(xv, w_ref[...], preferred_element_type=jnp.float32)

    if accumulate_in_out:
        # f32 output: accumulate directly into the VMEM-resident output block,
        # no scratch and no final copy.
        def kernel(x_ref, w_ref, b_ref, o_ref):
            @pl.when(pl.program_id(2) == 0)
            def _():
                o_ref[...] = jnp.broadcast_to(
                    b_ref[...], o_ref.shape).astype(o_ref.dtype)
            o_ref[...] += _partial(x_ref, w_ref).astype(o_ref.dtype)
    else:
        def kernel(x_ref, w_ref, b_ref, o_ref, acc_ref):
            k = pl.program_id(2)

            @pl.when(k == 0)
            def _():
                acc_ref[...] = jnp.zeros_like(acc_ref)

            acc_ref[...] += _partial(x_ref, w_ref)

            @pl.when(k == pl.num_programs(2) - 1)
            def _():
                o_ref[...] = (acc_ref[...] + b_ref[...]).astype(o_ref.dtype)

    return kernel


def _forward_tiled(x, weight, bias, *, tm=512, tn=None, tk=512,
                   compute_dtype=None):
    B, F = x.shape
    C = weight.shape[0]
    if tn is None:
        tn = 256 if _round_up(C, 128) >= 256 else 128
    Cp = _round_up(C, tn)
    tk = min(tk, _round_up(F, 128))
    Fp = _round_up(F, tk)
    out_dtype = x.dtype

    w_dtype = compute_dtype if compute_dtype is not None else weight.dtype
    # Only the (small) weight/bias are zero-padded; x stays untouched in HBM.
    w_t = jnp.zeros((Fp, Cp), w_dtype).at[:F, :C].set(weight.T.astype(w_dtype))
    b_p = jnp.zeros((1, Cp), jnp.float32).at[0, :C].set(
        bias.astype(jnp.float32))

    grid = (pl.cdiv(B, tm), Cp // tn, Fp // tk)   # K (reduction) last

    accumulate_in_out = jnp.dtype(out_dtype) == jnp.float32
    kernel = _make_tiled_kernel(F, tk, compute_dtype, accumulate_in_out)
    scratch = [] if accumulate_in_out else [pltpu.VMEM((tm, tn), jnp.float32)]

    x_bytes = jnp.dtype(x.dtype).itemsize
    w_bytes = jnp.dtype(w_dtype).itemsize

    out = pl.pallas_call(
        kernel,
        out_shape=jax.ShapeDtypeStruct((B, Cp), out_dtype),
        grid=grid,
        in_specs=[
            pl.BlockSpec((tm, tk), lambda i, j, k: (i, k)),
            pl.BlockSpec((tk, tn), lambda i, j, k: (k, j)),
            pl.BlockSpec((1, tn), lambda i, j, k: (0, j)),
        ],
        out_specs=pl.BlockSpec((tm, tn), lambda i, j, k: (i, j)),
        scratch_shapes=scratch,
        compiler_params=pltpu.CompilerParams(
            dimension_semantics=("parallel", "parallel", "arbitrary"),
            vmem_limit_bytes=48 * 1024 * 1024,
        ),
        cost_estimate=pl.CostEstimate(
            flops=2 * B * Fp * Cp,
            transcendentals=0,
            # Truthful traffic under this grid: x re-read per N block, W^T
            # re-read per M block.
            bytes_accessed=(B * F * x_bytes * grid[1]
                            + Fp * Cp * w_bytes * grid[0]
                            + Cp * 4
                            + B * Cp * jnp.dtype(out_dtype).itemsize),
        ),
    )(x, w_t, b_p)
    return out[:, :C]


# ---------------------------------------------------------------------------
# Dispatcher
# ---------------------------------------------------------------------------
def logistic_regression_forward(x, weight, bias, *, compute_dtype=None):
    """y = x @ weight.T + bias  (weight: (C, F), bias: (C,), x: (B, F)).

    compute_dtype=jnp.bfloat16 enables bf16 matmul inputs with f32
    accumulation (faster on bf16-native MXUs; numerics-visible change).
    """
    B, F = x.shape
    C = weight.shape[0]
    Cp = _round_up(C, 128)

    x_bytes = jnp.dtype(x.dtype).itemsize
    w_bytes = (jnp.dtype(compute_dtype).itemsize if compute_dtype is not None
               else jnp.dtype(weight.dtype).itemsize)

    budget = 24 * 1024 * 1024  # keep well under 48 MiB limit / 64 MiB (v7x)

    def wres_footprint(tm):
        return (2 * tm * F * x_bytes        # double-buffered x tile
                + 2 * F * Cp * w_bytes      # resident W^T (conservative x2)
                + 2 * tm * Cp * 4           # output tile
                + 2 * Cp * 4)               # bias

    tm = min(512, _round_up(B, 8))
    while tm > 8 and wres_footprint(tm) > budget:
        tm = max(8, _round_up(tm // 2, 8))

    if wres_footprint(tm) <= budget:
        # Give megacore (v7x: 2 TCs) at least two parallel M blocks when the
        # batch is big enough to be worth splitting.
        if B > 16 and pl.cdiv(B, tm) < 2:
            tm = max(8, _round_up(pl.cdiv(B, 2), 8))
        return _forward_weight_resident(
            x, weight, bias, tm=tm, compute_dtype=compute_dtype)

    return _forward_tiled(x, weight, bias, compute_dtype=compute_dtype)


if __name__ == "__main__":
    key = jax.random.PRNGKey(0)
    kx, kw, kb, kx2, kw2, kb2 = jax.random.split(key, 6)

    # --- Small shapes consistent with the module: B=8, F=32, C=10 ----------
    B, F, C = 8, 32, 10
    x = jax.random.normal(kx, (B, F), dtype=jnp.float32)
    bound = 1.0 / (F ** 0.5)
    w = jax.random.uniform(kw, (C, F), minval=-bound, maxval=bound,
                           dtype=jnp.float32)
    b = jax.random.uniform(kb, (C,), minval=-bound, maxval=bound,
                           dtype=jnp.float32)

    y = logistic_regression_forward(x, w, b)
    jax.block_until_ready(y)
    y_ref = x @ w.T + b
    assert y.shape == (B, C)
    assert jnp.allclose(y, y_ref, atol=1e-5, rtol=1e-5)

    # --- Larger shapes ------------------------------------------------------
    B2, F2, C2 = 200, 384, 150
    x2 = jax.random.normal(kx2, (B2, F2), dtype=jnp.float32)
    bound2 = 1.0 / (F2 ** 0.5)
    w2 = jax.random.uniform(kw2, (C2, F2), minval=-bound2, maxval=bound2,
                            dtype=jnp.float32)
    b2 = jax.random.uniform(kb2, (C2,), minval=-bound2, maxval=bound2,
                            dtype=jnp.float32)
    y2_ref = x2 @ w2.T + b2

    # Dispatcher picks the weight-resident path here.
    y2 = logistic_regression_forward(x2, w2, b2)
    jax.block_until_ready(y2)
    assert y2.shape == (B2, C2)
    assert jnp.allclose(y2, y2_ref, atol=1e-4, rtol=1e-4)

    # Force the unpadded-x tiled (M, N, K) path: exercises partial M blocks
    # and the in-kernel K-tail mask (384 % 256 != 0).
    y3 = _forward_tiled(x2, w2, b2, tm=128, tn=128, tk=256)
    jax.block_until_ready(y3)
    assert jnp.allclose(y3, y2_ref, atol=1e-4, rtol=1e-4)

    # bf16-compute / f32-accumulate option (numerics-visible, looser tol).
    y4 = logistic_regression_forward(x2, w2, b2, compute_dtype=jnp.bfloat16)
    jax.block_until_ready(y4)
    assert jnp.allclose(y4, y2_ref, atol=5e-2, rtol=5e-2)

    print("KERNEL_OK")
</pallas_src>

<mosaic_0001>
module attributes {stable_mosaic.version = 11 : i64} {
  func.func @kernel(%arg0: i32, %arg1: memref<8x32xf32, #tpu.memory_space<vmem>>, %arg2: memref<32x128xf32, #tpu.memory_space<vmem>>, %arg3: memref<1x128xf32, #tpu.memory_space<vmem>>, %arg4: memref<8x128xf32, #tpu.memory_space<vmem>>) attributes {dimension_semantics = [#tpu.dimension_semantics<parallel>], iteration_bounds = array<i64: 1>, scalar_prefetch = 0 : i64, scratch_operands = 0 : i64, tpu.core_type = #tpu.core_type<tc>, window_params = [{transform_indices = @transform_0, window_bounds = array<i64: 8, 32>}, {pipeline_mode = #tpu.pipeline_mode<synchronous>, transform_indices = @transform_1, window_bounds = array<i64: 32, 128>}, {pipeline_mode = #tpu.pipeline_mode<synchronous>, transform_indices = @transform_2, window_bounds = array<i64: 1, 128>}, {transform_indices = @transform_3, window_bounds = array<i64: 8, 128>}]} {
    %c0 = arith.constant 0 : index
    %c0_0 = arith.constant 0 : index
    %0 = vector.load %arg1[%c0, %c0_0] : memref<8x32xf32, #tpu.memory_space<vmem>>, vector<8x32xf32>
    %c0_1 = arith.constant 0 : index
    %c0_2 = arith.constant 0 : index
    %1 = vector.load %arg2[%c0_1, %c0_2] : memref<32x128xf32, #tpu.memory_space<vmem>>, vector<32x128xf32>
    %cst = arith.constant dense<0.000000e+00> : vector<8x128xf32>
    %2 = tpu.matmul %0, %1, %cst {dimension_numbers = #tpu.dot_dimension_numbers<[1], [0], [0], [1], [0, 0, 1, 1], [], []>} : vector<8x32xf32>, vector<32x128xf32>, vector<8x128xf32> -> vector<8x128xf32>
    %c0_3 = arith.constant 0 : index
    %c0_4 = arith.constant 0 : index
    %3 = vector.load %arg3[%c0_3, %c0_4] : memref<1x128xf32, #tpu.memory_space<vmem>>, vector<1x128xf32>
    %4 = vector.broadcast %3 : vector<1x128xf32> to vector<8x128xf32>
    %5 = arith.addf %2, %4 : vector<8x128xf32>
    %c0_5 = arith.constant 0 : index
    %c0_6 = arith.constant 0 : index
    %6 = vector.load %arg4[%c0_5, %c0_6] : memref<8x128xf32, #tpu.memory_space<vmem>>, vector<8x128xf32>
    tpu.vector_store %arg4[%c0_5, %c0_6], %5 {strides = array<i32>} : memref<8x128xf32, #tpu.memory_space<vmem>>, vector<8x128xf32>,
    return
  }
  func.func @transform_0(%arg0: i32) -> (i32, i32) {
    %c0_i32 = arith.constant 0 : i32
    %c0_i32_0 = arith.constant 0 : i32
    return %arg0, %c0_i32 : i32, i32
  }
  func.func @transform_1(%arg0: i32) -> (i32, i32) {
    %c0_i32 = arith.constant 0 : i32
    %c0_i32_0 = arith.constant 0 : i32
    %c0_i32_1 = arith.constant 0 : i32
    return %c0_i32, %c0_i32_0 : i32, i32
  }
  func.func @transform_2(%arg0: i32) -> (i32, i32) {
    %c0_i32 = arith.constant 0 : i32
    %c0_i32_0 = arith.constant 0 : i32
    %c0_i32_1 = arith.constant 0 : i32
    return %c0_i32, %c0_i32_0 : i32, i32
  }
  func.func @transform_3(%arg0: i32) -> (i32, i32) {
    %c0_i32 = arith.constant 0 : i32
    %c0_i32_0 = arith.constant 0 : i32
    return %arg0, %c0_i32 : i32, i32
  }
}

</mosaic_0001>

<bundles_post_ra>
// kernel: tpu_custom_call.1
= control target key start
LH: loop header
LB: loop body
LE: loop exit
PB: predicated region body
PF: predicated region fallthrough
CT: control target
= control target key end

     0   :  { %8 = vsyncpa [#allocation3], 0  ;;  %s274_s0 = inlined_call_operand.hbm [shape: f32[8,32], index: 0, kind: input, shape index: {}]   ;;  %s275_s1 = inlined_call_operand.hbm [shape: f32[32,128], index: 1, kind: input, shape index: {}]   ;;  %s276_s2 = inlined_call_operand.vmem [shape: f32[1,128], index: 2, kind: input, shape index: {}]   ;;  %s277_s3 = inlined_call_operand.hbm [shape: f32[8,128], index: 3, kind: output, shape index: {}]  }
   0x1   :  { %9 = vsyncpa [#allocation6], 0 }
   0x2   :  { %10 = vsyncpa [#allocation4], 0  ;;  %s235_s12 = smov [#allocation2]   ;;  %s236_s14 = smov [#allocation5]  }
   0x3   :  { %s17_s13 = sshll.u32 %s235_s12, 4  ;;  %s26_s15 = sshll.u32 %s236_s14, 4  ;;  %s18_s13 = int_to_ptr.vmem [resolvable:$true] %s17_s13  ;;  %s27_s15 = int_to_ptr.vmem [resolvable:$true] %s26_s15 }
   0x4   :  { %s177_s16 = scalar_lea.vmem %s18_s13, 128  ;;  %p182_p1 = scmp.lt.s32.totalorder %s18_s13, %s18_s13 }
   0x5   :  { %p178_p0 = scmp.ne.s32.totalorder %s18_s13, %s177_s16  ;;  %p183_p2 = scmp.lt.s32.totalorder %s177_s16, %s177_s16 }
   0x7   :  { %p184_p3 = por %p183_p2, %p182_p1 }
   0x9   :  { %p185_p4 = pnand %p184_p3, %p178_p0 }
   0xb   :  { %188 = shalt.err (!%p185_p4)
}
   0xc   :  { %20 = dma.hbm_to_vmem [thread:$0]  %s274_s0, 128, %s18_s13, [#allocation3]  }
   0xd   :  { %s197_s19 = scalar_lea.vmem %s27_s15, 512  ;;  %p202_p6 = scmp.lt.s32.totalorder %s27_s15, %s27_s15 }
   0xe   :  { %p198_p5 = scmp.ne.s32.totalorder %s27_s15, %s197_s19  ;;  %p203_p7 = scmp.lt.s32.totalorder %s197_s19, %s197_s19 }
  0x10   :  { %p204_p8 = por %p203_p7, %p202_p6 }
  0x12   :  { %p205_p9 = pnand %p204_p8, %p198_p5 }
  0x14   :  { %208 = shalt.err (!%p205_p9)
}
  0x15   :  { %s237_s20 = smov 128   ;;  %s238_s21 = smov 8  }
  0x16   :  { %32 = dma.hbm_to_vmem [thread:$0]  %s275_s1, 512, %s27_s15, [#allocation6], %s237_s20, %s237_s20, %s238_s21  }
  0x17   :  { %229 = dma.done.wait [#allocation3], 128  }
  0x18   :  { %230 = vsyncadd [#allocation3], 4294967168 }
  0x19   :  { %231 = dma.done.wait [#allocation6], 512  }
  0x1a   :  { %232 = vsyncadd [#allocation6], 4294966784  ;;  %v239_v0 = vmov 0.0   ;;  %vm240_vm0 = vmmov 0   ;;  %v45_v1 = vld [vmem:[#allocation5 + $0x18] sm:$0xff]  ;;  %v44_v2 = vld [vmem:[#allocation5 + $0x10] sm:$0xff] }
  0x1b   :  { %151 = vmatprep.subr.mxu0 %v239_v0  ;;  %159 = vmatprep.mubr.msk.f32.mxu0 %vm240_vm0, %v239_v0  ;;  %v43_v3 = vld [vmem:[#allocation5 + $0x8] sm:$0xff]  ;;  %v42_v4 = vld [vmem:[#allocation5] sm:$0xff]  ;;  %v41_v5 = vld [vmem:[#allocation2] sm:$0xff]  ;;  %vm53_vm1 = vcmask 261120   ;;  %s241_s24 = smov [#allocation7]  }
  0x1c   :  { %152 = vmatpush3.msra.mxu0 %v45_v1  ;;  %v144_v6 = vld [vmem:[%s276_s2] ss:$0 sm:$0xff]  ;;  %s134_s25 = sshll.u32 %s241_s24, 4  ;;  %s135_s25 = int_to_ptr.vmem [resolvable:$true] %s134_s25 }
  0x1d   :  { %153 = vmatprep.subr.mxu0 %v239_v0  ;;  %s209_s26 = scalar_lea.vmem %s135_s25, 128  ;;  %p214_p11 = scmp.lt.s32.totalorder %s135_s25, %s135_s25 }
  0x1e   :  { %154 = vmatpush3.msra.mxu0 %v44_v2  ;;  %p210_p10 = scmp.ne.s32.totalorder %s135_s25, %s209_s26  ;;  %p215_p12 = scmp.lt.s32.totalorder %s209_s26, %s209_s26 }
  0x1f   :  { %155 = vmatprep.subr.mxu0 %v239_v0 }
  0x20   :  { %156 = vmatpush3.msra.mxu0 %v43_v3  ;;  %p216_p13 = por %p215_p12, %p214_p11 }
  0x21   :  { %157 = vmatprep.subr.mxu0 %v239_v0 }
  0x22   :  { %158 = vmatpush3.msra.mxu0 %v42_v4  ;;  %p217_p0 = pnand %p216_p13, %p210_p10 }
  0x23   :  { %160 = vmatmul.mubr.msk.f32.vlgmr.msra.gmra.mxu0 %vm53_vm1, %v41_v5 }
  0xe3   :  { %v123_v7 = vpop.f32.mrf.mxu0 }
  0xe4   :  { %v124_v8 = vadd.f32 %v144_v6, %v123_v7 }
  0xe5   :  { %v161_v9 = vpop.f32.mrf.mxu0 }
  0xe6   :  { %127 = vst [vmem:[#allocation7] sm:$0xff] %v124_v8 }
  0xe7   :  { %220 = shalt.err (!%p217_p0)
}
  0xe8   :  { %137 = dma.vmem_to_hbm [thread:$0]  %s135_s25, 128, %s277_s3, [#allocation4]  }
  0xe9   :  { %233 = dma.done.wait [#allocation4], 128  }
  0xea   :  { %234 = vsyncadd [#allocation4], 4294967168 }
  0xeb   :  { %141 = vsyncpa [#allocation3], 1 }
  0xec   :  { %142 = vsyncpa [#allocation6], 1 }
  0xed   :  { %143 = vsyncpa [#allocation4], 1 }

</bundles_post_ra>
